<compile_context>
chip_gen: v6e
topology: v6e:2x2x1
jax: 0.10.0
libtpu: 0.0.40
codegen_flags: <defaults>
</compile_context>

<pallas_src>
import math

import jax
import jax.numpy as jnp
from jax import lax
from jax.experimental import pallas as pl
from jax.experimental.pallas import tpu as pltpu

# ---- model config (small, consistent with the module) ----
B = 2          # batch
T = 8          # sequence length
C = 32         # n_embd
NH = 4         # n_head
HS = C // NH   # head_size = 8
RD = 4         # rotary_dim (< head_size -> exercises the q_rot/q_pass concat path)
BT = B * T
SCALE = 1.0 / math.sqrt(HS)


def _attn_kernel(x_ref, wqkv_ref, bqkv_ref, wproj_ref, bproj_ref,
                 pswap_ref, cosf_ref, sinf_ref, o_ref, y_scr):
    # Single invocation: batch folded into the M (row) dimension.
    x = x_ref[...]                                           # (BT, C) bf16

    # --- fused QKV projection (MXU, bf16 operands, f32 accumulation) ---
    qkv = jnp.dot(x, wqkv_ref[...], preferred_element_type=jnp.float32)
    qkv = qkv + bqkv_ref[...]                                # (BT, 3C) f32
    q = qkv[:, 0 * C:1 * C]
    k = qkv[:, 1 * C:2 * C]
    v = qkv[:, 2 * C:3 * C]

    # --- RoPE on 2-D (BT, C) tensors ---
    # Full-width tables: cos_full is 1 outside the rotary lanes; sin_full is
    # signed (-sin on even rotary lanes, +sin on odd, 0 elsewhere).  The
    # even/odd pair swap is a constant permutation matmul (idle MXU), so the
    # whole rotation is 1 tiny matmul + 2 VPU muls + 1 add, all in (BT, C).
    cosf = cosf_ref[...]
    sinf = sinf_ref[...]
    pswap = pswap_ref[...]

    def rope(t):
        swapped = jnp.dot(t.astype(jnp.bfloat16), pswap,
                          preferred_element_type=jnp.float32)
        return t * cosf + swapped * sinf

    q = rope(q)
    k = rope(k)

    # --- bidirectional attention, fully unrolled over (batch, head) ---
    # Operands stay 2-D and lane-resident; results land in a (BT, C) VMEM
    # accumulator so the output projection runs on one contiguous slab.
    for b in range(B):
        r0 = b * T
        for h in range(NH):
            c0 = h * HS
            qh = q[r0:r0 + T, c0:c0 + HS].astype(jnp.bfloat16)
            kh = k[r0:r0 + T, c0:c0 + HS].astype(jnp.bfloat16)
            vh = v[r0:r0 + T, c0:c0 + HS].astype(jnp.bfloat16)
            # q @ k^T without an explicit transpose (contract last dims).
            logits = lax.dot_general(
                qh, kh, (((1,), (1,)), ((), ())),
                preferred_element_type=jnp.float32) * SCALE          # (T, T) f32
            m = jnp.max(logits, axis=-1, keepdims=True)
            p = jnp.exp(logits - m)
            attn = p * pl.reciprocal(jnp.sum(p, axis=-1, keepdims=True),
                                     approx=True)
            yh = jnp.dot(attn.astype(jnp.bfloat16), vh,
                         preferred_element_type=jnp.float32)          # (T, HS) f32
            y_scr[r0:r0 + T, c0:c0 + HS] = yh

    # --- output projection (residual dropout is the eval-mode identity) ---
    y = y_scr[...].astype(jnp.bfloat16)
    out = jnp.dot(y, wproj_ref[...], preferred_element_type=jnp.float32)
    out = out + bproj_ref[...]
    o_ref[...] = out.astype(o_ref.dtype)


@jax.jit
def bidirectional_self_attention(x, wqkv, bqkv, wproj, bproj, cos, sin):
    """x: (B, T, C) f32; weights stored [in, out]; cos/sin: (T, RD//2) f32."""
    # ---- precompute full-width RoPE tables + pair-swap permutation ----
    cos_pairs = jnp.repeat(cos, 2, axis=1)                              # (T, RD)
    cos_head = jnp.concatenate(
        [cos_pairs, jnp.ones((T, HS - RD), cos.dtype)], axis=1)         # (T, HS)
    sin_signed = jnp.stack([-sin, sin], axis=-1).reshape(T, RD)         # (T, RD)
    sin_head = jnp.concatenate(
        [sin_signed, jnp.zeros((T, HS - RD), sin.dtype)], axis=1)       # (T, HS)
    cos_full = jnp.tile(jnp.tile(cos_head, (1, NH)), (B, 1))            # (BT, C)
    sin_full = jnp.tile(jnp.tile(sin_head, (1, NH)), (B, 1))            # (BT, C)

    lane = jnp.arange(C)
    head_off = (lane // HS) * HS
    j = lane - head_off
    is_rot = j < RD
    partner = jnp.where(is_rot, head_off + (j ^ 1), lane)
    pswap = (jax.nn.one_hot(partner, C, dtype=jnp.float32)
             * is_rot[:, None].astype(jnp.float32)).astype(jnp.bfloat16)  # (C, C)

    # ---- single-invocation kernel on the (B*T, C) slab ----
    x2 = x.reshape(BT, C).astype(jnp.bfloat16)
    out2 = pl.pallas_call(
        _attn_kernel,
        out_shape=jax.ShapeDtypeStruct((BT, C), jnp.float32),
        scratch_shapes=[pltpu.VMEM((BT, C), jnp.float32)],
    )(x2,
      wqkv.astype(jnp.bfloat16), bqkv,
      wproj.astype(jnp.bfloat16), bproj,
      pswap, cos_full, sin_full)
    return out2.reshape(B, T, C)


# ---------------- pure-JAX f32 reference (mirrors the PyTorch forward) ----------------
def _apply_rope_ref(x, cos, sin, rd):
    """x: (T, NH, HS); cos/sin: (T, rd//2). Interleaved (complex-pair) RoPE."""
    t, nh, hs = x.shape
    x_rot, x_pass = x[..., :rd], x[..., rd:]
    xr = x_rot.reshape(t, nh, rd // 2, 2)
    xe, xo = xr[..., 0], xr[..., 1]
    c = cos[:, None, :]
    s = sin[:, None, :]
    oe = xe * c - xo * s
    oo = xe * s + xo * c
    out_rot = jnp.stack([oe, oo], axis=-1).reshape(t, nh, rd)
    if rd < hs:
        return jnp.concatenate([out_rot, x_pass], axis=-1)
    return out_rot


def _reference(x, wqkv, bqkv, wproj, bproj, cos, sin):
    qkv = x @ wqkv + bqkv                       # (B, T, 3C)
    q, k, v = jnp.split(qkv, 3, axis=-1)
    q = q.reshape(B, T, NH, HS)
    k = k.reshape(B, T, NH, HS)
    v = v.reshape(B, T, NH, HS)
    q = jax.vmap(lambda a: _apply_rope_ref(a, cos, sin, RD))(q)
    k = jax.vmap(lambda a: _apply_rope_ref(a, cos, sin, RD))(k)
    logits = jnp.einsum('bqhd,bkhd->bhqk', q, k) * SCALE
    attn = jax.nn.softmax(logits, axis=-1)
    y = jnp.einsum('bhqk,bkhd->bqhd', attn, v).reshape(B, T, C)
    return y @ wproj + bproj


if __name__ == "__main__":
    key = jax.random.PRNGKey(0)
    kx, kw1, kb1, kw2, kb2 = jax.random.split(key, 5)

    x = jax.random.normal(kx, (B, T, C), dtype=jnp.float32)

    # Deterministic parameter init (GPT-style scale), stored as [in, out].
    wqkv = 0.02 * jax.random.normal(kw1, (C, 3 * C), dtype=jnp.float32)
    bqkv = 0.02 * jax.random.normal(kb1, (1, 3 * C), dtype=jnp.float32)
    wproj = 0.02 * jax.random.normal(kw2, (C, C), dtype=jnp.float32)
    bproj = 0.02 * jax.random.normal(kb2, (1, C), dtype=jnp.float32)

    # RoPE frequency tables (theta = 10000), shape (T, RD//2).
    inv_freq = 1.0 / (10000.0 ** (jnp.arange(0, RD, 2, dtype=jnp.float32) / RD))
    angles = jnp.arange(T, dtype=jnp.float32)[:, None] * inv_freq[None, :]
    cos = jnp.cos(angles)
    sin = jnp.sin(angles)

    out = bidirectional_self_attention(x, wqkv, bqkv, wproj, bproj, cos, sin)
    out = jax.block_until_ready(out)

    ref = _reference(x, wqkv, bqkv, wproj, bproj, cos, sin)
    assert out.shape == (B, T, C)
    # Tolerance relaxed: bf16 MXU operands + approx reciprocal in the kernel.
    assert jnp.allclose(out, ref, atol=1e-2, rtol=1e-2), "mismatch vs JAX reference"

    print("KERNEL_OK")
</pallas_src>

<mosaic_0001>
module attributes {stable_mosaic.version = 11 : i64} {
  func.func @_attn_kernel(%arg0: memref<16x32xbf16, #tpu.memory_space<vmem>>, %arg1: memref<32x96xbf16, #tpu.memory_space<vmem>>, %arg2: memref<1x96xf32, #tpu.memory_space<vmem>>, %arg3: memref<32x32xbf16, #tpu.memory_space<vmem>>, %arg4: memref<1x32xf32, #tpu.memory_space<vmem>>, %arg5: memref<32x32xbf16, #tpu.memory_space<vmem>>, %arg6: memref<16x32xf32, #tpu.memory_space<vmem>>, %arg7: memref<16x32xf32, #tpu.memory_space<vmem>>, %arg8: memref<16x32xf32, #tpu.memory_space<vmem>>, %arg9: memref<16x32xf32, #tpu.memory_space<vmem>>) attributes {dimension_semantics = [], scalar_prefetch = 0 : i64, scratch_operands = 1 : i64, tpu.core_type = #tpu.core_type<tc>} {
    %c0 = arith.constant 0 : index
    %c0_0 = arith.constant 0 : index
    %0 = vector.load %arg0[%c0, %c0_0] : memref<16x32xbf16, #tpu.memory_space<vmem>>, vector<16x32xbf16>
    %c0_1 = arith.constant 0 : index
    %c0_2 = arith.constant 0 : index
    %1 = vector.load %arg1[%c0_1, %c0_2] : memref<32x96xbf16, #tpu.memory_space<vmem>>, vector<32x96xbf16>
    %cst = arith.constant dense<0.000000e+00> : vector<16x96xf32>
    %2 = tpu.matmul %0, %1, %cst {dimension_numbers = #tpu.dot_dimension_numbers<[1], [0], [0], [1], [0, 0, 1, 1], [], []>} : vector<16x32xbf16>, vector<32x96xbf16>, vector<16x96xf32> -> vector<16x96xf32>
    %c0_3 = arith.constant 0 : index
    %c0_4 = arith.constant 0 : index
    %3 = vector.load %arg2[%c0_3, %c0_4] : memref<1x96xf32, #tpu.memory_space<vmem>>, vector<1x96xf32>
    %4 = vector.broadcast %3 : vector<1x96xf32> to vector<16x96xf32>
    %5 = arith.addf %2, %4 : vector<16x96xf32>
    %6 = vector.extract_strided_slice %5 {offsets = [0, 0], sizes = [16, 32], strides = [1, 1]} : vector<16x96xf32> to vector<16x32xf32>
    %7 = vector.extract_strided_slice %5 {offsets = [0, 32], sizes = [16, 32], strides = [1, 1]} : vector<16x96xf32> to vector<16x32xf32>
    %8 = vector.extract_strided_slice %5 {offsets = [0, 64], sizes = [16, 32], strides = [1, 1]} : vector<16x96xf32> to vector<16x32xf32>
    %c0_5 = arith.constant 0 : index
    %c0_6 = arith.constant 0 : index
    %9 = vector.load %arg6[%c0_5, %c0_6] : memref<16x32xf32, #tpu.memory_space<vmem>>, vector<16x32xf32>
    %c0_7 = arith.constant 0 : index
    %c0_8 = arith.constant 0 : index
    %10 = vector.load %arg7[%c0_7, %c0_8] : memref<16x32xf32, #tpu.memory_space<vmem>>, vector<16x32xf32>
    %c0_9 = arith.constant 0 : index
    %c0_10 = arith.constant 0 : index
    %11 = vector.load %arg5[%c0_9, %c0_10] : memref<32x32xbf16, #tpu.memory_space<vmem>>, vector<32x32xbf16>
    %12 = arith.truncf %6 : vector<16x32xf32> to vector<16x32xbf16>
    %cst_11 = arith.constant dense<0.000000e+00> : vector<16x32xf32>
    %13 = tpu.matmul %12, %11, %cst_11 {dimension_numbers = #tpu.dot_dimension_numbers<[1], [0], [0], [1], [0, 0, 1, 1], [], []>} : vector<16x32xbf16>, vector<32x32xbf16>, vector<16x32xf32> -> vector<16x32xf32>
    %14 = arith.mulf %6, %9 : vector<16x32xf32>
    %15 = arith.mulf %13, %10 : vector<16x32xf32>
    %16 = arith.addf %14, %15 : vector<16x32xf32>
    %17 = arith.truncf %7 : vector<16x32xf32> to vector<16x32xbf16>
    %cst_12 = arith.constant dense<0.000000e+00> : vector<16x32xf32>
    %18 = tpu.matmul %17, %11, %cst_12 {dimension_numbers = #tpu.dot_dimension_numbers<[1], [0], [0], [1], [0, 0, 1, 1], [], []>} : vector<16x32xbf16>, vector<32x32xbf16>, vector<16x32xf32> -> vector<16x32xf32>
    %19 = arith.mulf %7, %9 : vector<16x32xf32>
    %20 = arith.mulf %18, %10 : vector<16x32xf32>
    %21 = arith.addf %19, %20 : vector<16x32xf32>
    %22 = vector.extract_strided_slice %16 {offsets = [0, 0], sizes = [8, 8], strides = [1, 1]} : vector<16x32xf32> to vector<8x8xf32>
    %23 = arith.truncf %22 : vector<8x8xf32> to vector<8x8xbf16>
    %24 = vector.extract_strided_slice %21 {offsets = [0, 0], sizes = [8, 8], strides = [1, 1]} : vector<16x32xf32> to vector<8x8xf32>
    %25 = arith.truncf %24 : vector<8x8xf32> to vector<8x8xbf16>
    %26 = vector.extract_strided_slice %8 {offsets = [0, 0], sizes = [8, 8], strides = [1, 1]} : vector<16x32xf32> to vector<8x8xf32>
    %27 = arith.truncf %26 : vector<8x8xf32> to vector<8x8xbf16>
    %cst_13 = arith.constant dense<0.000000e+00> : vector<8x8xf32>
    %28 = tpu.matmul %23, %25, %cst_13 {dimension_numbers = #tpu.dot_dimension_numbers<[1], [1], [0], [0], [0, 0, 1, 0], [], []>} : vector<8x8xbf16>, vector<8x8xbf16>, vector<8x8xf32> -> vector<8x8xf32>
    %cst_14 = arith.constant 0.353553385 : f32
    %29 = vector.broadcast %cst_14 : f32 to vector<8x8xf32>
    %30 = arith.mulf %28, %29 : vector<8x8xf32>
    %cst_15 = arith.constant dense<0xFF800000> : vector<8xf32>
    %31 = vector.multi_reduction <maximumf>, %30, %cst_15 [1] : vector<8x8xf32> to vector<8xf32>
    %32 = vector.shape_cast %31 : vector<8xf32> to vector<8x1xf32>
    %33 = vector.broadcast %32 : vector<8x1xf32> to vector<8x8xf32>
    %34 = arith.subf %30, %33 : vector<8x8xf32>
    %35 = math.exp %34 : vector<8x8xf32>
    %cst_16 = arith.constant dense<0.000000e+00> : vector<8xf32>
    %36 = vector.multi_reduction <add>, %35, %cst_16 [1] : vector<8x8xf32> to vector<8xf32>
    %37 = vector.shape_cast %36 : vector<8xf32> to vector<8x1xf32>
    %38 = tpu.reciprocal %37 {approx = true} : vector<8x1xf32> -> vector<8x1xf32>
    %39 = vector.broadcast %38 : vector<8x1xf32> to vector<8x8xf32>
    %40 = arith.mulf %35, %39 : vector<8x8xf32>
    %41 = arith.truncf %40 : vector<8x8xf32> to vector<8x8xbf16>
    %cst_17 = arith.constant dense<0.000000e+00> : vector<8x8xf32>
    %42 = tpu.matmul %41, %27, %cst_17 {dimension_numbers = #tpu.dot_dimension_numbers<[1], [0], [0], [1], [0, 0, 1, 1], [], []>} : vector<8x8xbf16>, vector<8x8xbf16>, vector<8x8xf32> -> vector<8x8xf32>
    %c0_18 = arith.constant 0 : index
    %c0_19 = arith.constant 0 : index
    %43 = vector.load %arg9[%c0_18, %c0_19] : memref<16x32xf32, #tpu.memory_space<vmem>>, vector<8x8xf32>
    tpu.vector_store %arg9[%c0_18, %c0_19], %42 {strides = array<i32>} : memref<16x32xf32, #tpu.memory_space<vmem>>, vector<8x8xf32>,
    %44 = vector.extract_strided_slice %16 {offsets = [0, 8], sizes = [8, 8], strides = [1, 1]} : vector<16x32xf32> to vector<8x8xf32>
    %45 = arith.truncf %44 : vector<8x8xf32> to vector<8x8xbf16>
    %46 = vector.extract_strided_slice %21 {offsets = [0, 8], sizes = [8, 8], strides = [1, 1]} : vector<16x32xf32> to vector<8x8xf32>
    %47 = arith.truncf %46 : vector<8x8xf32> to vector<8x8xbf16>
    %48 = vector.extract_strided_slice %8 {offsets = [0, 8], sizes = [8, 8], strides = [1, 1]} : vector<16x32xf32> to vector<8x8xf32>
    %49 = arith.truncf %48 : vector<8x8xf32> to vector<8x8xbf16>
    %cst_20 = arith.constant dense<0.000000e+00> : vector<8x8xf32>
    %50 = tpu.matmul %45, %47, %cst_20 {dimension_numbers = #tpu.dot_dimension_numbers<[1], [1], [0], [0], [0, 0, 1, 0], [], []>} : vector<8x8xbf16>, vector<8x8xbf16>, vector<8x8xf32> -> vector<8x8xf32>
    %cst_21 = arith.constant 0.353553385 : f32
    %51 = vector.broadcast %cst_21 : f32 to vector<8x8xf32>
    %52 = arith.mulf %50, %51 : vector<8x8xf32>
    %cst_22 = arith.constant dense<0xFF800000> : vector<8xf32>
    %53 = vector.multi_reduction <maximumf>, %52, %cst_22 [1] : vector<8x8xf32> to vector<8xf32>
    %54 = vector.shape_cast %53 : vector<8xf32> to vector<8x1xf32>
    %55 = vector.broadcast %54 : vector<8x1xf32> to vector<8x8xf32>
    %56 = arith.subf %52, %55 : vector<8x8xf32>
    %57 = math.exp %56 : vector<8x8xf32>
    %cst_23 = arith.constant dense<0.000000e+00> : vector<8xf32>
    %58 = vector.multi_reduction <add>, %57, %cst_23 [1] : vector<8x8xf32> to vector<8xf32>
    %59 = vector.shape_cast %58 : vector<8xf32> to vector<8x1xf32>
    %60 = tpu.reciprocal %59 {approx = true} : vector<8x1xf32> -> vector<8x1xf32>
    %61 = vector.broadcast %60 : vector<8x1xf32> to vector<8x8xf32>
    %62 = arith.mulf %57, %61 : vector<8x8xf32>
    %63 = arith.truncf %62 : vector<8x8xf32> to vector<8x8xbf16>
    %cst_24 = arith.constant dense<0.000000e+00> : vector<8x8xf32>
    %64 = tpu.matmul %63, %49, %cst_24 {dimension_numbers = #tpu.dot_dimension_numbers<[1], [0], [0], [1], [0, 0, 1, 1], [], []>} : vector<8x8xbf16>, vector<8x8xbf16>, vector<8x8xf32> -> vector<8x8xf32>
    %c0_25 = arith.constant 0 : index
    %c8 = arith.constant 8 : index
    %65 = vector.load %arg9[%c0_25, %c8] : memref<16x32xf32, #tpu.memory_space<vmem>>, vector<8x8xf32>
    tpu.vector_store %arg9[%c0_25, %c8], %64 {strides = array<i32>} : memref<16x32xf32, #tpu.memory_space<vmem>>, vector<8x8xf32>,
    %66 = vector.extract_strided_slice %16 {offsets = [0, 16], sizes = [8, 8], strides = [1, 1]} : vector<16x32xf32> to vector<8x8xf32>
    %67 = arith.truncf %66 : vector<8x8xf32> to vector<8x8xbf16>
    %68 = vector.extract_strided_slice %21 {offsets = [0, 16], sizes = [8, 8], strides = [1, 1]} : vector<16x32xf32> to vector<8x8xf32>
    %69 = arith.truncf %68 : vector<8x8xf32> to vector<8x8xbf16>
    %70 = vector.extract_strided_slice %8 {offsets = [0, 16], sizes = [8, 8], strides = [1, 1]} : vector<16x32xf32> to vector<8x8xf32>
    %71 = arith.truncf %70 : vector<8x8xf32> to vector<8x8xbf16>
    %cst_26 = arith.constant dense<0.000000e+00> : vector<8x8xf32>
    %72 = tpu.matmul %67, %69, %cst_26 {dimension_numbers = #tpu.dot_dimension_numbers<[1], [1], [0], [0], [0, 0, 1, 0], [], []>} : vector<8x8xbf16>, vector<8x8xbf16>, vector<8x8xf32> -> vector<8x8xf32>
    %cst_27 = arith.constant 0.353553385 : f32
    %73 = vector.broadcast %cst_27 : f32 to vector<8x8xf32>
    %74 = arith.mulf %72, %73 : vector<8x8xf32>
    %cst_28 = arith.constant dense<0xFF800000> : vector<8xf32>
    %75 = vector.multi_reduction <maximumf>, %74, %cst_28 [1] : vector<8x8xf32> to vector<8xf32>
    %76 = vector.shape_cast %75 : vector<8xf32> to vector<8x1xf32>
    %77 = vector.broadcast %76 : vector<8x1xf32> to vector<8x8xf32>
    %78 = arith.subf %74, %77 : vector<8x8xf32>
    %79 = math.exp %78 : vector<8x8xf32>
    %cst_29 = arith.constant dense<0.000000e+00> : vector<8xf32>
    %80 = vector.multi_reduction <add>, %79, %cst_29 [1] : vector<8x8xf32> to vector<8xf32>
    %81 = vector.shape_cast %80 : vector<8xf32> to vector<8x1xf32>
    %82 = tpu.reciprocal %81 {approx = true} : vector<8x1xf32> -> vector<8x1xf32>
    %83 = vector.broadcast %82 : vector<8x1xf32> to vector<8x8xf32>
    %84 = arith.mulf %79, %83 : vector<8x8xf32>
    %85 = arith.truncf %84 : vector<8x8xf32> to vector<8x8xbf16>
    %cst_30 = arith.constant dense<0.000000e+00> : vector<8x8xf32>
    %86 = tpu.matmul %85, %71, %cst_30 {dimension_numbers = #tpu.dot_dimension_numbers<[1], [0], [0], [1], [0, 0, 1, 1], [], []>} : vector<8x8xbf16>, vector<8x8xbf16>, vector<8x8xf32> -> vector<8x8xf32>
    %c0_31 = arith.constant 0 : index
    %c16 = arith.constant 16 : index
    %87 = vector.load %arg9[%c0_31, %c16] : memref<16x32xf32, #tpu.memory_space<vmem>>, vector<8x8xf32>
    tpu.vector_store %arg9[%c0_31, %c16], %86 {strides = array<i32>} : memref<16x32xf32, #tpu.memory_space<vmem>>, vector<8x8xf32>,
    %88 = vector.extract_strided_slice %16 {offsets = [0, 24], sizes = [8, 8], strides = [1, 1]} : vector<16x32xf32> to vector<8x8xf32>
    %89 = arith.truncf %88 : vector<8x8xf32> to vector<8x8xbf16>
    %90 = vector.extract_strided_slice %21 {offsets = [0, 24], sizes = [8, 8], strides = [1, 1]} : vector<16x32xf32> to vector<8x8xf32>
    %91 = arith.truncf %90 : vector<8x8xf32> to vector<8x8xbf16>
    %92 = vector.extract_strided_slice %8 {offsets = [0, 24], sizes = [8, 8], strides = [1, 1]} : vector<16x32xf32> to vector<8x8xf32>
    %93 = arith.truncf %92 : vector<8x8xf32> to vector<8x8xbf16>
    %cst_32 = arith.constant dense<0.000000e+00> : vector<8x8xf32>
    %94 = tpu.matmul %89, %91, %cst_32 {dimension_numbers = #tpu.dot_dimension_numbers<[1], [1], [0], [0], [0, 0, 1, 0], [], []>} : vector<8x8xbf16>, vector<8x8xbf16>, vector<8x8xf32> -> vector<8x8xf32>
    %cst_33 = arith.constant 0.353553385 : f32
    %95 = vector.broadcast %cst_33 : f32 to vector<8x8xf32>
    %96 = arith.mulf %94, %95 : vector<8x8xf32>
    %cst_34 = arith.constant dense<0xFF800000> : vector<8xf32>
    %97 = vector.multi_reduction <maximumf>, %96, %cst_34 [1] : vector<8x8xf32> to vector<8xf32>
    %98 = vector.shape_cast %97 : vector<8xf32> to vector<8x1xf32>
    %99 = vector.broadcast %98 : vector<8x1xf32> to vector<8x8xf32>
    %100 = arith.subf %96, %99 : vector<8x8xf32>
    %101 = math.exp %100 : vector<8x8xf32>
    %cst_35 = arith.constant dense<0.000000e+00> : vector<8xf32>
    %102 = vector.multi_reduction <add>, %101, %cst_35 [1] : vector<8x8xf32> to vector<8xf32>
    %103 = vector.shape_cast %102 : vector<8xf32> to vector<8x1xf32>
    %104 = tpu.reciprocal %103 {approx = true} : vector<8x1xf32> -> vector<8x1xf32>
    %105 = vector.broadcast %104 : vector<8x1xf32> to vector<8x8xf32>
    %106 = arith.mulf %101, %105 : vector<8x8xf32>
    %107 = arith.truncf %106 : vector<8x8xf32> to vector<8x8xbf16>
    %cst_36 = arith.constant dense<0.000000e+00> : vector<8x8xf32>
    %108 = tpu.matmul %107, %93, %cst_36 {dimension_numbers = #tpu.dot_dimension_numbers<[1], [0], [0], [1], [0, 0, 1, 1], [], []>} : vector<8x8xbf16>, vector<8x8xbf16>, vector<8x8xf32> -> vector<8x8xf32>
    %c0_37 = arith.constant 0 : index
    %c24 = arith.constant 24 : index
    %109 = vector.load %arg9[%c0_37, %c24] : memref<16x32xf32, #tpu.memory_space<vmem>>, vector<8x8xf32>
    tpu.vector_store %arg9[%c0_37, %c24], %108 {strides = array<i32>} : memref<16x32xf32, #tpu.memory_space<vmem>>, vector<8x8xf32>,
    %110 = vector.extract_strided_slice %16 {offsets = [8, 0], sizes = [8, 8], strides = [1, 1]} : vector<16x32xf32> to vector<8x8xf32>
    %111 = arith.truncf %110 : vector<8x8xf32> to vector<8x8xbf16>
    %112 = vector.extract_strided_slice %21 {offsets = [8, 0], sizes = [8, 8], strides = [1, 1]} : vector<16x32xf32> to vector<8x8xf32>
    %113 = arith.truncf %112 : vector<8x8xf32> to vector<8x8xbf16>
    %114 = vector.extract_strided_slice %8 {offsets = [8, 0], sizes = [8, 8], strides = [1, 1]} : vector<16x32xf32> to vector<8x8xf32>
    %115 = arith.truncf %114 : vector<8x8xf32> to vector<8x8xbf16>
    %cst_38 = arith.constant dense<0.000000e+00> : vector<8x8xf32>
    %116 = tpu.matmul %111, %113, %cst_38 {dimension_numbers = #tpu.dot_dimension_numbers<[1], [1], [0], [0], [0, 0, 1, 0], [], []>} : vector<8x8xbf16>, vector<8x8xbf16>, vector<8x8xf32> -> vector<8x8xf32>
    %cst_39 = arith.constant 0.353553385 : f32
    %117 = vector.broadcast %cst_39 : f32 to vector<8x8xf32>
    %118 = arith.mulf %116, %117 : vector<8x8xf32>
    %cst_40 = arith.constant dense<0xFF800000> : vector<8xf32>
    %119 = vector.multi_reduction <maximumf>, %118, %cst_40 [1] : vector<8x8xf32> to vector<8xf32>
    %120 = vector.shape_cast %119 : vector<8xf32> to vector<8x1xf32>
    %121 = vector.broadcast %120 : vector<8x1xf32> to vector<8x8xf32>
    %122 = arith.subf %118, %121 : vector<8x8xf32>
    %123 = math.exp %122 : vector<8x8xf32>
    %cst_41 = arith.constant dense<0.000000e+00> : vector<8xf32>
    %124 = vector.multi_reduction <add>, %123, %cst_41 [1] : vector<8x8xf32> to vector<8xf32>
    %125 = vector.shape_cast %124 : vector<8xf32> to vector<8x1xf32>
    %126 = tpu.reciprocal %125 {approx = true} : vector<8x1xf32> -> vector<8x1xf32>
    %127 = vector.broadcast %126 : vector<8x1xf32> to vector<8x8xf32>
    %128 = arith.mulf %123, %127 : vector<8x8xf32>
    %129 = arith.truncf %128 : vector<8x8xf32> to vector<8x8xbf16>
    %cst_42 = arith.constant dense<0.000000e+00> : vector<8x8xf32>
    %130 = tpu.matmul %129, %115, %cst_42 {dimension_numbers = #tpu.dot_dimension_numbers<[1], [0], [0], [1], [0, 0, 1, 1], [], []>} : vector<8x8xbf16>, vector<8x8xbf16>, vector<8x8xf32> -> vector<8x8xf32>
    %c8_43 = arith.constant 8 : index
    %c0_44 = arith.constant 0 : index
    %131 = vector.load %arg9[%c8_43, %c0_44] : memref<16x32xf32, #tpu.memory_space<vmem>>, vector<8x8xf32>
    tpu.vector_store %arg9[%c8_43, %c0_44], %130 {strides = array<i32>} : memref<16x32xf32, #tpu.memory_space<vmem>>, vector<8x8xf32>,
    %132 = vector.extract_strided_slice %16 {offsets = [8, 8], sizes = [8, 8], strides = [1, 1]} : vector<16x32xf32> to vector<8x8xf32>
    %133 = arith.truncf %132 : vector<8x8xf32> to vector<8x8xbf16>
    %134 = vector.extract_strided_slice %21 {offsets = [8, 8], sizes = [8, 8], strides = [1, 1]} : vector<16x32xf32> to vector<8x8xf32>
    %135 = arith.truncf %134 : vector<8x8xf32> to vector<8x8xbf16>
    %136 = vector.extract_strided_slice %8 {offsets = [8, 8], sizes = [8, 8], strides = [1, 1]} : vector<16x32xf32> to vector<8x8xf32>
    %137 = arith.truncf %136 : vector<8x8xf32> to vector<8x8xbf16>
    %cst_45 = arith.constant dense<0.000000e+00> : vector<8x8xf32>
    %138 = tpu.matmul %133, %135, %cst_45 {dimension_numbers = #tpu.dot_dimension_numbers<[1], [1], [0], [0], [0, 0, 1, 0], [], []>} : vector<8x8xbf16>, vector<8x8xbf16>, vector<8x8xf32> -> vector<8x8xf32>
    %cst_46 = arith.constant 0.353553385 : f32
    %139 = vector.broadcast %cst_46 : f32 to vector<8x8xf32>
    %140 = arith.mulf %138, %139 : vector<8x8xf32>
    %cst_47 = arith.constant dense<0xFF800000> : vector<8xf32>
    %141 = vector.multi_reduction <maximumf>, %140, %cst_47 [1] : vector<8x8xf32> to vector<8xf32>
    %142 = vector.shape_cast %141 : vector<8xf32> to vector<8x1xf32>
    %143 = vector.broadcast %142 : vector<8x1xf32> to vector<8x8xf32>
    %144 = arith.subf %140, %143 : vector<8x8xf32>
    %145 = math.exp %144 : vector<8x8xf32>
    %cst_48 = arith.constant dense<0.000000e+00> : vector<8xf32>
    %146 = vector.multi_reduction <add>, %145, %cst_48 [1] : vector<8x8xf32> to vector<8xf32>
    %147 = vector.shape_cast %146 : vector<8xf32> to vector<8x1xf32>
    %148 = tpu.reciprocal %147 {approx = true} : vector<8x1xf32> -> vector<8x1xf32>
    %149 = vector.broadcast %148 : vector<8x1xf32> to vector<8x8xf32>
    %150 = arith.mulf %145, %149 : vector<8x8xf32>
    %151 = arith.truncf %150 : vector<8x8xf32> to vector<8x8xbf16>
    %cst_49 = arith.constant dense<0.000000e+00> : vector<8x8xf32>
    %152 = tpu.matmul %151, %137, %cst_49 {dimension_numbers = #tpu.dot_dimension_numbers<[1], [0], [0], [1], [0, 0, 1, 1], [], []>} : vector<8x8xbf16>, vector<8x8xbf16>, vector<8x8xf32> -> vector<8x8xf32>
    %c8_50 = arith.constant 8 : index
    %c8_51 = arith.constant 8 : index
    %153 = vector.load %arg9[%c8_50, %c8_51] : memref<16x32xf32, #tpu.memory_space<vmem>>, vector<8x8xf32>
    tpu.vector_store %arg9[%c8_50, %c8_51], %152 {strides = array<i32>} : memref<16x32xf32, #tpu.memory_space<vmem>>, vector<8x8xf32>,
    %154 = vector.extract_strided_slice %16 {offsets = [8, 16], sizes = [8, 8], strides = [1, 1]} : vector<16x32xf32> to vector<8x8xf32>
    %155 = arith.truncf %154 : vector<8x8xf32> to vector<8x8xbf16>
    %156 = vector.extract_strided_slice %21 {offsets = [8, 16], sizes = [8, 8], strides = [1, 1]} : vector<16x32xf32> to vector<8x8xf32>
    %157 = arith.truncf %156 : vector<8x8xf32> to vector<8x8xbf16>
    %158 = vector.extract_strided_slice %8 {offsets = [8, 16], sizes = [8, 8], strides = [1, 1]} : vector<16x32xf32> to vector<8x8xf32>
    %159 = arith.truncf %158 : vector<8x8xf32> to vector<8x8xbf16>
    %cst_52 = arith.constant dense<0.000000e+00> : vector<8x8xf32>
    %160 = tpu.matmul %155, %157, %cst_52 {dimension_numbers = #tpu.dot_dimension_numbers<[1], [1], [0], [0], [0, 0, 1, 0], [], []>} : vector<8x8xbf16>, vector<8x8xbf16>, vector<8x8xf32> -> vector<8x8xf32>
    %cst_53 = arith.constant 0.353553385 : f32
    %161 = vector.broadcast %cst_53 : f32 to vector<8x8xf32>
    %162 = arith.mulf %160, %161 : vector<8x8xf32>
    %cst_54 = arith.constant dense<0xFF800000> : vector<8xf32>
    %163 = vector.multi_reduction <maximumf>, %162, %cst_54 [1] : vector<8x8xf32> to vector<8xf32>
    %164 = vector.shape_cast %163 : vector<8xf32> to vector<8x1xf32>
    %165 = vector.broadcast %164 : vector<8x1xf32> to vector<8x8xf32>
    %166 = arith.subf %162, %165 : vector<8x8xf32>
    %167 = math.exp %166 : vector<8x8xf32>
    %cst_55 = arith.constant dense<0.000000e+00> : vector<8xf32>
    %168 = vector.multi_reduction <add>, %167, %cst_55 [1] : vector<8x8xf32> to vector<8xf32>
    %169 = vector.shape_cast %168 : vector<8xf32> to vector<8x1xf32>
    %170 = tpu.reciprocal %169 {approx = true} : vector<8x1xf32> -> vector<8x1xf32>
    %171 = vector.broadcast %170 : vector<8x1xf32> to vector<8x8xf32>
    %172 = arith.mulf %167, %171 : vector<8x8xf32>
    %173 = arith.truncf %172 : vector<8x8xf32> to vector<8x8xbf16>
    %cst_56 = arith.constant dense<0.000000e+00> : vector<8x8xf32>
    %174 = tpu.matmul %173, %159, %cst_56 {dimension_numbers = #tpu.dot_dimension_numbers<[1], [0], [0], [1], [0, 0, 1, 1], [], []>} : vector<8x8xbf16>, vector<8x8xbf16>, vector<8x8xf32> -> vector<8x8xf32>
    %c8_57 = arith.constant 8 : index
    %c16_58 = arith.constant 16 : index
    %175 = vector.load %arg9[%c8_57, %c16_58] : memref<16x32xf32, #tpu.memory_space<vmem>>, vector<8x8xf32>
    tpu.vector_store %arg9[%c8_57, %c16_58], %174 {strides = array<i32>} : memref<16x32xf32, #tpu.memory_space<vmem>>, vector<8x8xf32>,
    %176 = vector.extract_strided_slice %16 {offsets = [8, 24], sizes = [8, 8], strides = [1, 1]} : vector<16x32xf32> to vector<8x8xf32>
    %177 = arith.truncf %176 : vector<8x8xf32> to vector<8x8xbf16>
    %178 = vector.extract_strided_slice %21 {offsets = [8, 24], sizes = [8, 8], strides = [1, 1]} : vector<16x32xf32> to vector<8x8xf32>
    %179 = arith.truncf %178 : vector<8x8xf32> to vector<8x8xbf16>
    %180 = vector.extract_strided_slice %8 {offsets = [8, 24], sizes = [8, 8], strides = [1, 1]} : vector<16x32xf32> to vector<8x8xf32>
    %181 = arith.truncf %180 : vector<8x8xf32> to vector<8x8xbf16>
    %cst_59 = arith.constant dense<0.000000e+00> : vector<8x8xf32>
    %182 = tpu.matmul %177, %179, %cst_59 {dimension_numbers = #tpu.dot_dimension_numbers<[1], [1], [0], [0], [0, 0, 1, 0], [], []>} : vector<8x8xbf16>, vector<8x8xbf16>, vector<8x8xf32> -> vector<8x8xf32>
    %cst_60 = arith.constant 0.353553385 : f32
    %183 = vector.broadcast %cst_60 : f32 to vector<8x8xf32>
    %184 = arith.mulf %182, %183 : vector<8x8xf32>
    %cst_61 = arith.constant dense<0xFF800000> : vector<8xf32>
    %185 = vector.multi_reduction <maximumf>, %184, %cst_61 [1] : vector<8x8xf32> to vector<8xf32>
    %186 = vector.shape_cast %185 : vector<8xf32> to vector<8x1xf32>
    %187 = vector.broadcast %186 : vector<8x1xf32> to vector<8x8xf32>
    %188 = arith.subf %184, %187 : vector<8x8xf32>
    %189 = math.exp %188 : vector<8x8xf32>
    %cst_62 = arith.constant dense<0.000000e+00> : vector<8xf32>
    %190 = vector.multi_reduction <add>, %189, %cst_62 [1] : vector<8x8xf32> to vector<8xf32>
    %191 = vector.shape_cast %190 : vector<8xf32> to vector<8x1xf32>
    %192 = tpu.reciprocal %191 {approx = true} : vector<8x1xf32> -> vector<8x1xf32>
    %193 = vector.broadcast %192 : vector<8x1xf32> to vector<8x8xf32>
    %194 = arith.mulf %189, %193 : vector<8x8xf32>
    %195 = arith.truncf %194 : vector<8x8xf32> to vector<8x8xbf16>
    %cst_63 = arith.constant dense<0.000000e+00> : vector<8x8xf32>
    %196 = tpu.matmul %195, %181, %cst_63 {dimension_numbers = #tpu.dot_dimension_numbers<[1], [0], [0], [1], [0, 0, 1, 1], [], []>} : vector<8x8xbf16>, vector<8x8xbf16>, vector<8x8xf32> -> vector<8x8xf32>
    %c8_64 = arith.constant 8 : index
    %c24_65 = arith.constant 24 : index
    %197 = vector.load %arg9[%c8_64, %c24_65] : memref<16x32xf32, #tpu.memory_space<vmem>>, vector<8x8xf32>
    tpu.vector_store %arg9[%c8_64, %c24_65], %196 {strides = array<i32>} : memref<16x32xf32, #tpu.memory_space<vmem>>, vector<8x8xf32>,
    %c0_66 = arith.constant 0 : index
    %c0_67 = arith.constant 0 : index
    %198 = vector.load %arg9[%c0_66, %c0_67] : memref<16x32xf32, #tpu.memory_space<vmem>>, vector<16x32xf32>
    %199 = arith.truncf %198 : vector<16x32xf32> to vector<16x32xbf16>
    %c0_68 = arith.constant 0 : index
    %c0_69 = arith.constant 0 : index
    %200 = vector.load %arg3[%c0_68, %c0_69] : memref<32x32xbf16, #tpu.memory_space<vmem>>, vector<32x32xbf16>
    %cst_70 = arith.constant dense<0.000000e+00> : vector<16x32xf32>
    %201 = tpu.matmul %199, %200, %cst_70 {dimension_numbers = #tpu.dot_dimension_numbers<[1], [0], [0], [1], [0, 0, 1, 1], [], []>} : vector<16x32xbf16>, vector<32x32xbf16>, vector<16x32xf32> -> vector<16x32xf32>
    %c0_71 = arith.constant 0 : index
    %c0_72 = arith.constant 0 : index
    %202 = vector.load %arg4[%c0_71, %c0_72] : memref<1x32xf32, #tpu.memory_space<vmem>>, vector<1x32xf32>
    %203 = vector.broadcast %202 : vector<1x32xf32> to vector<16x32xf32>
    %204 = arith.addf %201, %203 : vector<16x32xf32>
    %c0_73 = arith.constant 0 : index
    %c0_74 = arith.constant 0 : index
    %205 = vector.load %arg8[%c0_73, %c0_74] : memref<16x32xf32, #tpu.memory_space<vmem>>, vector<16x32xf32>
    tpu.vector_store %arg8[%c0_73, %c0_74], %204 {strides = array<i32>} : memref<16x32xf32, #tpu.memory_space<vmem>>, vector<16x32xf32>,
    return
  }
}

</mosaic_0001>

<bundles_post_ra>
// kernel: bidirectional_self_attention.1
= control target key start
LH: loop header
LB: loop body
LE: loop exit
PB: predicated region body
PF: predicated region fallthrough
CT: control target
= control target key end

     0   :  { %v1548_v1 = vmov 0.0   ;;  %vm1549_vm0 = vmmov 0   ;;  %vm61_vm1 = vcmask 261120   ;;  %s1844_s0 = inlined_call_operand.vmem [shape: bf16[16,32], index: 0, kind: input, shape index: {}]   ;;  %s1845_s1 = inlined_call_operand.vmem [shape: bf16[32,96], index: 1, kind: input, shape index: {}]   ;;  %s1846_s2 = inlined_call_operand.vmem [shape: f32[1,96], index: 2, kind: input, shape index: {}]   ;;  %s1847_s3 = inlined_call_operand.vmem [shape: bf16[32,32], index: 3, kind: input, shape index: {}]   ;;  %s1848_s4 = inlined_call_operand.vmem [shape: f32[1,32], index: 4, kind: input, shape index: {}]   ;;  %s1849_s5 = inlined_call_operand.vmem [shape: bf16[32,32], index: 5, kind: input, shape index: {}]   ;;  %s1850_s6 = inlined_call_operand.vmem [shape: f32[16,32], index: 6, kind: input, shape index: {}]   ;;  %s1851_s7 = inlined_call_operand.vmem [shape: f32[16,32], index: 7, kind: input, shape index: {}]   ;;  %s1852_s8 = inlined_call_operand.hbm [shape: f32[16,32], index: 8, kind: output, shape index: {}]  }
   0x1   :  { %v1487_v0 = vld [vmem:[%s1845_s1 + $0x8] sm:$0xff]   ;;  %1340 = vmatprep.subr.bf16.mxu0 %v1548_v1  ;;  %1348 = vmatprep.subr.bf16.mxu1 %v1548_v1  ;;  %v1488_v2 = vld [vmem:[%s1845_s1] sm:$0xff]  }
   0x2   :  { %1341 = vmatpush3.bf16.msra.mxu0 %v1487_v0  ;;  %1344 = vmatprep.mubr.msk.bf16.mxu0 %vm1549_vm0, %v1548_v1  ;;  %v1489_v3 = vld [vmem:[%s1844_s0] sm:$0xff]  }
   0x3   :  { %1342 = vmatprep.subr.bf16.mxu0 %v1548_v1  ;;  %1352 = vmatprep.mubr.msk.bf16.mxu1 %vm1549_vm0, %v1548_v1 }
   0x6   :  { %1343 = vmatpush3.bf16.msra.mxu0 %v1488_v2 }
   0x7   :  { %13 = vsyncpa [#allocation4], 0  ;;  %1356 = vmatprep.subr.bf16.mxu0 %v1548_v1  ;;  %v1490_v4 = vld [vmem:[%s1849_s5 + $0x8] sm:$0xff]   ;;  %v1491_v5 = vld [vmem:[%s1849_s5] sm:$0xff]   ;;  %s1550_s5 = smov 96   ;;  %s1551_s16 = smov 32  }
   0x8   :  { %1349 = vmatpush3.bf16.msra.mxu1 %v1490_v4  ;;  %v1267_v7 = vld [vmem:[%s1846_s2] ss:$0 sm:$0xff]  ;;  %v109_v27 = vld [vmem:[%s1851_s7 + $0x8] sm:$0xff]  ;;  %s1552_s23 = smov 88   ;;  %s1554_s24 = smov 80   ;;  %vm252_vm2 = vcmask 64512  }
   0x9   :  { %1345 = vmatmul.mubr.msk.bf16.vlgmr.msra.gmra.mxu0 %vm61_vm1, %v1489_v3  ;;  %1350 = vmatprep.subr.bf16.mxu1 %v1548_v1  ;;  %v106_v14 = vld [vmem:[%s1850_s6] sm:$0xff]  ;;  %v107_v31 = vld [vmem:[%s1850_s6 + $0x8] sm:$0xff]  ;;  %s1555_s6 = smov 112   ;;  %s1556_s25 = smov 72   ;;  %vm318_vm3 = vcmask 1043456   ;;  %vm479_vm4 = vcmask 130112  }
   0xa   :  { %1360 = vmatprep.mubr.msk.bf16.mxu0 %vm1549_vm0, %v1548_v1  ;;  %1357 = vmatpush3.bf16.msra.mxu0 %v1490_v4  ;;  %v108_v16 = vld [vmem:[%s1851_s7] sm:$0xff]  ;;  %s1553_s7 = smov 120   ;;  %s1557_s26 = smov 104   ;;  %vm596_vm5 = vcmask 195712   ;;  %vm713_vm6 = vcmask 261312  }
   0xb   :  { %1358 = vmatprep.subr.bf16.mxu0 %v1548_v1  ;;  %s1558_s27 = smov 56   ;;  %s1559_s28 = smov 64  }
   0xc   :  { %1351 = vmatpush3.bf16.msra.mxu1 %v1491_v5  ;;  %s1560_s29 = smov 48   ;;  %s1561_s30 = smov 40  }
   0xd   :  { %1364 = vmatprep.subr.bf16.mxu1 %v1548_v1  ;;  %s1562_s9 = smov 8   ;;  %s1563_s10 = smov 16  }
   0xe   :  { %1359 = vmatpush3.bf16.msra.mxu0 %v1491_v5  ;;  %s1564_s1 = smov 24  }
   0xf   :  { %1370 = vmatprep.subr.bf16.mxu0 %v1548_v1 }
  0xc9   :  { %v99_v6 = vpop.f32.mrf.mxu0 }
  0xca   :  { %v1645_v10 = vadd.f32 %v1267_v7, %v99_v6 }
  0xcb   :  { %v1346_v8 = vpop.f32.mrf.mxu0 }
  0xcc   :  { %v171_v18 = vmul.f32 %v106_v14, %v1645_v10 }
  0xcd   :  { %v102_v9 = vpop.f32.mrf.mxu0 }
  0xce   :  { %v1647_v11 = vadd.f32 %v1267_v7, %v102_v9 }
  0xcf   :  { %v1347_v12 = vpop.f32.mrf.mxu0 }
  0xd0   :  { %v114_v13 = vpack.c.bf16 %v1647_v11, %v1645_v10  ;;  %v172_v43 = vmul.f32 %v107_v31, %v1647_v11 }
  0xd2   :  { %178 = vrot.lane.b32.xlu0 %v114_v13, %s1550_s5  ;;  %1353 = vmatmul.mubr.msk.bf16.vlgmr.msra.gmra.mxu1 %vm61_vm1, %v114_v13 }
  0xd3   :  { %1366 = vmatprep.mubr.msk.bf16.mxu1 %vm1549_vm0, %v1548_v1 }
  0xd6   :  { %226 = vrot.lane.b32.xlu0 %v106_v14, %s1551_s16 }
 0x144   :  { %v179_v15 = vpop.permute.xlu0 %178 }
 0x145   :  { %1361 = vmatmul.mubr.msk.bf16.vlgmr.msra.gmra.mxu0 %vm61_vm1, %v179_v15 }
 0x146   :  { %1372 = vmatprep.mubr.msk.bf16.mxu0 %vm1549_vm0, %v1548_v1 }
 0x148   :  { %v227_v32 = vpop.permute.xlu0 %226 }
 0x149   :  { %v232_v33 = vmul.f32 %v227_v32, %v1645_v10 }
 0x192   :  { %v164_v17 = vpop.f32.mrf.mxu1 }
 0x193   :  { %v173_v19 = vmul.f32 %v164_v17, %v108_v16 }
 0x194   :  { %v1354_v20 = vpop.f32.mrf.mxu1 }
 0x195   :  { %v175_v21 = vadd.f32 %v173_v19, %v171_v18 }
 0x196   :  { %v167_v22 = vpop.f32.mrf.mxu1 }
 0x197   :  { %v246_v38 = vpack.c.bf16 %v175_v21, %v175_v21  ;;  %v174_v41 = vmul.f32 %v167_v22, %v109_v27 }
 0x198   :  { %v1355_v23 = vpop.f32.mrf.mxu1 }
 0x199   :  { %v176_v44 = vadd.f32 %v174_v41, %v172_v43 }
 0x19b   :  { %v715_v46 = vpack.c.bf16 %v176_v44, %v176_v44 }
 0x205   :  { %v217_v24 = vpop.f32.mrf.mxu0 }
 0x206   :  { %v234_v25 = vmul.f32 %v217_v24, %v108_v16 }
 0x207   :  { %v1362_v26 = vpop.f32.mrf.mxu0 }
 0x208   :  { %238 = vrot.lane.b32.xlu1 %v234_v25, %s1551_s16 }
 0x209   :  { %v220_v28 = vpop.f32.mrf.mxu0 }
 0x20a   :  { %v235_v29 = vmul.f32 %v220_v28, %v109_v27 }
 0x20b   :  { %v1363_v30 = vpop.f32.mrf.mxu0 }
 0x20c   :  { %228 = vrot.lane.b32.xlu1 %v107_v31, %s1551_s16  ;;  %240 = vrot.lane.b32.xlu0 %v235_v29, %s1551_s16 }
 0x27a   :  { %v239_v34 = vpop.permute.xlu1 %238 }
 0x27b   :  { %v244_v35 = vadd.f32 %v239_v34, %v232_v33 }
 0x27d   :  { %v247_v36 = vpack.c.bf16 %v244_v35, %v244_v35 }
 0x27e   :  { %v229_v37 = vpop.permute.xlu1 %228  ;;  %v241_v40 = vpop.permute.xlu0 %240 }
 0x27f   :  { %250 = vrot.lane.b32.xlu1 %v247_v36, %s1550_s5  ;;  %366 = vrot.lane.b32.xlu0 %v247_v36, %s1552_s23  ;;  %v233_v39 = vmul.f32 %v229_v37, %v1647_v11 }
 0x281   :  { %v245_v42 = vadd.f32 %v241_v40, %v233_v39 }
 0x283   :  { %364 = vrot.lane.b32.xlu1 %v246_v38, %s1553_s7  ;;  %483 = vrot.lane.b32.xlu0 %v247_v36, %s1554_s24  ;;  %v716_v45 = vpack.c.bf16 %v245_v42, %v245_v42 }
 0x287   :  { %481 = vrot.lane.b32.xlu1 %v246_v38, %s1555_s6  ;;  %600 = vrot.lane.b32.xlu0 %v247_v36, %s1556_s25 }
 0x28b   :  { %598 = vrot.lane.b32.xlu1 %v246_v38, %s1557_s26  ;;  %719 = vrot.lane.b32.xlu0 %v716_v45, %s1550_s5  ;;  %s1565_s5 = smov [#allocation3]  }
 0x28c   :  { %s1256_s15 = sshll.u32 %s1565_s5, 4  ;;  %s1257_s15 = int_to_ptr.vmem [resolvable:$true] %s1256_s15 }
 0x28d   :  { %s1526_s2 = scalar_lea.vmem %s1257_s15, 256  ;;  %p1531_p1 = scmp.lt.s32.totalorder %s1257_s15, %s1257_s15 }
 0x28e   :  { %p1527_p0 = scmp.ne.s32.totalorder %s1257_s15, %s1526_s2  ;;  %p1532_p2 = scmp.lt.s32.totalorder %s1526_s2, %s1526_s2 }
 0x28f   :  { %833 = vrot.lane.b32.xlu1 %v716_v45, %s1552_s23  ;;  %831 = vrot.lane.b32.xlu0 %v715_v46, %s1553_s7 }
 0x290   :  { %p1533_p3 = por %p1532_p2, %p1531_p1 }
 0x292   :  { %p1534_p4 = pnand %p1533_p3, %p1527_p0 }
 0x293   :  { %949 = vrot.lane.b32.xlu1 %v716_v45, %s1554_s24  ;;  %947 = vrot.lane.b32.xlu0 %v715_v46, %s1555_s6 }
 0x297   :  { %1065 = vrot.lane.b32.xlu1 %v716_v45, %s1556_s25  ;;  %1063 = vrot.lane.b32.xlu0 %v715_v46, %s1557_s26 }
 0x2f1   :  { %v251_v47 = vpop.permute.xlu1 %250  ;;  %v367_v49 = vpop.permute.xlu0 %366 }
 0x2f2   :  { %v257_v48 = vsel %vm252_vm2, %v251_v47, 0  ;;  %v372_v50 = vsel %vm252_vm2, %v367_v49, 0 }
 0x2f3   :  { %1365 = vmatpush3.bf16.xpose.msra.mxu1 %v257_v48 }
 0x2f4   :  { %1376 = vmatprep.subr.bf16.mxu1 %v1548_v1 }
 0x2f5   :  { %v484_v51 = vpop.permute.xlu0 %483  ;;  %v365_v52 = vpop.permute.xlu1 %364 }
 0x2f6   :  { %v489_v53 = vsel %vm252_vm2, %v484_v51, 0 }
 0x2f9   :  { %v601_v54 = vpop.permute.xlu0 %600  ;;  %v482_v55 = vpop.permute.xlu1 %481 }
 0x2fa   :  { %1367 = vmatmul.mubr.msk.bf16.vlgmr.msra.gmra.mxu1 %vm252_vm2, %v246_v38  ;;  %v606_v56 = vsel %vm252_vm2, %v601_v54, 0 }
 0x2fb   :  { %1377 = vmatpush3.bf16.xpose.msra.mxu1 %v372_v50  ;;  %1378 = vmatprep.mubr.msk.bf16.mxu1 %vm1549_vm0, %v1548_v1 }
 0x2fc   :  { %1388 = vmatprep.subr.bf16.mxu1 %v1548_v1 }
 0x2fd   :  { %v720_v57 = vpop.permute.xlu0 %719  ;;  %v599_v58 = vpop.permute.xlu1 %598 }
 0x2fe   :  { %v725_v59 = vsel %vm252_vm2, %v720_v57, 0 }
 0x301   :  { %v834_v60 = vpop.permute.xlu1 %833  ;;  %v832_v63 = vpop.permute.xlu0 %831 }
 0x302   :  { %1379 = vmatmul.mubr.msk.bf16.vlgmr.msra.gmra.mxu1 %vm252_vm2, %v365_v52  ;;  %v839_v61 = vsel %vm252_vm2, %v834_v60, 0  ;;  %v248_v52 = vpack.c.bf16 %v1645_v10, %v1645_v10 }
 0x303   :  { %1389 = vmatpush3.bf16.xpose.msra.mxu1 %v489_v53  ;;  %1390 = vmatprep.mubr.msk.bf16.mxu1 %vm1549_vm0, %v1548_v1 }
 0x304   :  { %1400 = vmatprep.subr.bf16.mxu1 %v1548_v1 }
 0x305   :  { %v950_v62 = vpop.permute.xlu1 %949  ;;  %v948_v3 = vpop.permute.xlu0 %947 }
 0x306   :  { %v955_v0 = vsel %vm252_vm2, %v950_v62, 0 }
 0x309   :  { %v1066_v2 = vpop.permute.xlu1 %1065  ;;  %v1064_v5 = vpop.permute.xlu0 %1063 }
 0x30a   :  { %1391 = vmatmul.mubr.msk.bf16.vlgmr.msra.gmra.mxu1 %vm252_vm2, %v482_v55  ;;  %v1071_v4 = vsel %vm252_vm2, %v1066_v2, 0 }
 0x30b   :  { %1401 = vmatpush3.bf16.xpose.msra.mxu1 %v606_v56  ;;  %1402 = vmatprep.mubr.msk.bf16.mxu1 %vm1549_vm0, %v1548_v1 }
 0x30c   :  { %1412 = vmatprep.subr.bf16.mxu1 %v1548_v1 }
 0x312   :  { %1403 = vmatmul.mubr.msk.bf16.vlgmr.msra.gmra.mxu1 %vm252_vm2, %v599_v58 }
 0x313   :  { %1413 = vmatpush3.bf16.xpose.msra.mxu1 %v725_v59  ;;  %1414 = vmatprep.mubr.msk.bf16.mxu1 %vm1549_vm0, %v1548_v1 }
 0x314   :  { %1424 = vmatprep.subr.bf16.mxu1 %v1548_v1 }
 0x31a   :  { %1415 = vmatmul.mubr.msk.bf16.vlgmr.msra.gmra.mxu1 %vm252_vm2, %v715_v46 }
 0x31b   :  { %1425 = vmatpush3.bf16.xpose.msra.mxu1 %v839_v61  ;;  %1426 = vmatprep.mubr.msk.bf16.mxu1 %vm1549_vm0, %v1548_v1 }
 0x31c   :  { %1436 = vmatprep.subr.bf16.mxu1 %v1548_v1 }
 0x322   :  { %1427 = vmatmul.mubr.msk.bf16.vlgmr.msra.gmra.mxu1 %vm252_vm2, %v832_v63 }
 0x323   :  { %1437 = vmatpush3.bf16.xpose.msra.mxu1 %v955_v0  ;;  %1438 = vmatprep.mubr.msk.bf16.mxu1 %vm1549_vm0, %v1548_v1 }
 0x324   :  { %1448 = vmatprep.subr.bf16.mxu1 %v1548_v1 }
 0x32a   :  { %1439 = vmatmul.mubr.msk.bf16.vlgmr.msra.gmra.mxu1 %vm252_vm2, %v948_v3 }
 0x32b   :  { %1449 = vmatpush3.bf16.xpose.msra.mxu1 %v1071_v4  ;;  %1450 = vmatprep.mubr.msk.bf16.mxu1 %vm1549_vm0, %v1548_v1 }
 0x32c   :  { %1460 = vmatprep.subr.bf16.mxu1 %v1548_v1 }
 0x332   :  { %1451 = vmatmul.mubr.msk.bf16.vlgmr.msra.gmra.mxu1 %vm252_vm2, %v1064_v5 }
 0x333   :  { %1464 = vmatprep.mubr.msk.bf16.mxu1 %vm1549_vm0, %v1548_v1 }
 0x3ba   :  { %v293_v6 = vpop.f32.mrf.mxu1 }
 0x3bb   :  { %v1716_v7 = vmul.f32 0.35355338, %v293_v6 }
 0x3bc   :  { %v1368_v8 = vpop.f32.mrf.mxu1 }
 0x3bd   :  { %v300_v9 = vsel %vm252_vm2, %v1716_v7, -inf }
 0x3be   :  { %v296_v12 = vpop.f32.mrf.mxu1  ;;  %301 = vmax.xlane.f32.xlu1 %v300_v9 }
 0x3c0   :  { %v1369_v13 = vpop.f32.mrf.mxu1 }
 0x3c2   :  { %v408_v14 = vpop.f32.mrf.mxu1 }
 0x3c3   :  { %v414_v15 = vmul.f32 0.35355338, %v408_v14 }
 0x3c4   :  { %v1380_v16 = vpop.f32.mrf.mxu1 }
 0x3c5   :  { %v415_v17 = vsel %vm252_vm2, %v414_v15, -inf }
 0x3c6   :  { %416 = vmax.xlane.f32.xlu0 %v415_v17  ;;  %v411_v18 = vpop.f32.mrf.mxu1 }
 0x3c8   :  { %v1381_v19 = vpop.f32.mrf.mxu1 }
 0x3ca   :  { %v525_v20 = vpop.f32.mrf.mxu1 }
 0x3cb   :  { %v531_v21 = vmul.f32 0.35355338, %v525_v20 }
 0x3cc   :  { %v1392_v22 = vpop.f32.mrf.mxu1 }
 0x3cd   :  { %v532_v23 = vsel %vm252_vm2, %v531_v21, -inf }
 0x3ce   :  { %533 = vmax.xlane.f32.xlu0 %v532_v23  ;;  %v528_v24 = vpop.f32.mrf.mxu1 }
 0x3d0   :  { %v1393_v25 = vpop.f32.mrf.mxu1 }
 0x3d2   :  { %v642_v26 = vpop.f32.mrf.mxu1 }
 0x3d3   :  { %v648_v27 = vmul.f32 0.35355338, %v642_v26 }
 0x3d4   :  { %v1404_v28 = vpop.f32.mrf.mxu1 }
 0x3d5   :  { %v649_v29 = vsel %vm252_vm2, %v648_v27, -inf }
 0x3d6   :  { %650 = vmax.xlane.f32.xlu1 %v649_v29  ;;  %v645_v30 = vpop.f32.mrf.mxu1 }
 0x3d8   :  { %v1405_v31 = vpop.f32.mrf.mxu1 }
 0x3da   :  { %v761_v32 = vpop.f32.mrf.mxu1 }
 0x3db   :  { %v767_v33 = vmul.f32 0.35355338, %v761_v32 }
 0x3dc   :  { %v1416_v34 = vpop.f32.mrf.mxu1 }
 0x3dd   :  { %v768_v35 = vsel %vm252_vm2, %v767_v33, -inf }
 0x3de   :  { %769 = vmax.xlane.f32.xlu0 %v768_v35  ;;  %v764_v36 = vpop.f32.mrf.mxu1 }
 0x3df   :  { %v717_v36 = vpack.c.bf16 %v1647_v11, %v1647_v11 }
 0x3e0   :  { %v1417_v37 = vpop.f32.mrf.mxu1 }
 0x3e2   :  { %v875_v38 = vpop.f32.mrf.mxu1 }
 0x3e3   :  { %v1724_v39 = vmul.f32 0.35355338, %v875_v38 }
 0x3e4   :  { %v1428_v40 = vpop.f32.mrf.mxu1 }
 0x3e5   :  { %v882_v41 = vsel %vm252_vm2, %v1724_v39, -inf }
 0x3e6   :  { %883 = vmax.xlane.f32.xlu1 %v882_v41  ;;  %v878_v42 = vpop.f32.mrf.mxu1 }
 0x3e8   :  { %v1429_v43 = vpop.f32.mrf.mxu1 }
 0x3ea   :  { %v991_v44 = vpop.f32.mrf.mxu1 }
 0x3eb   :  { %v997_v45 = vmul.f32 0.35355338, %v991_v44 }
 0x3ec   :  { %v1440_v46 = vpop.f32.mrf.mxu1 }
 0x3ed   :  { %v998_v47 = vsel %vm252_vm2, %v997_v45, -inf }
 0x3ee   :  { %999 = vmax.xlane.f32.xlu0 %v998_v47  ;;  %v994_v48 = vpop.f32.mrf.mxu1 }
 0x3f0   :  { %v1441_v49 = vpop.f32.mrf.mxu1 }
 0x3f2   :  { %v1107_v50 = vpop.f32.mrf.mxu1 }
 0x3f3   :  { %v1733_v55 = vmul.f32 0.35355338, %v1107_v50 }
 0x3f4   :  { %v1452_v51 = vpop.f32.mrf.mxu1 }
 0x3f5   :  { %v1114_v56 = vsel %vm252_vm2, %v1733_v55, -inf }
 0x3f6   :  { %v1110_v53 = vpop.f32.mrf.mxu1 }
 0x3f7   :  { %427 = vrot.lane.b32.xlu1 %v248_v52, %s1558_s27 }
 0x3f8   :  { %v1453_v54 = vpop.f32.mrf.mxu1 }
 0x404   :  { %313 = vrot.lane.b32.xlu0 %v248_v52, %s1559_s28 }
 0x41b   :  { %1115 = vmax.xlane.f32.xlu1 %v1114_v56 }
 0x42c   :  { %544 = vrot.lane.b32.xlu1 %v248_v52, %s1560_s29 }
 0x447   :  { %v302_v57 = vpop.xlane.xlu1 %301 }
 0x448   :  { %v303_v10 = vsub.f32 %v1716_v7, %v302_v57 }
 0x44a   :  { %v304_v58 = vmul.f32 1.442695, %v303_v10 }
 0x44c   :  { %1494 = vpow2.f32 %v304_v58 }
 0x44f   :  { %v417_v59 = vpop.xlane.xlu0 %416 }
 0x450   :  { %v418_v60 = vsub.f32 %v414_v15, %v417_v59 }
 0x452   :  { %v419_v61 = vmul.f32 1.442695, %v418_v60 }
 0x454   :  { %1496 = vpow2.f32 %v419_v61 }
 0x457   :  { %v534_v62 = vpop.xlane.xlu0 %533 }
 0x458   :  { %v535_v63 = vsub.f32 %v531_v21, %v534_v62 }
 0x459   :  { %v1739_v0 = vpop.eup %1494 }
 0x45a   :  { %v536_v2 = vmul.f32 1.442695, %v535_v63  ;;  %v306_v3 = vsel %vm252_vm2, %v1739_v0, 0.0 }
 0x45b   :  { %307 = vadd.xlane.f32.xlu0 %v306_v3 }
 0x45c   :  { %1498 = vpow2.f32 %v536_v2 }
 0x45f   :  { %v651_v4 = vpop.xlane.xlu1 %650 }
 0x460   :  { %v652_v5 = vsub.f32 %v648_v27, %v651_v4 }
 0x461   :  { %v1743_v6 = vpop.eup %1496 }
 0x462   :  { %v653_v7 = vmul.f32 1.442695, %v652_v5  ;;  %v421_v8 = vsel %vm252_vm2, %v1743_v6, 0.0 }
 0x463   :  { %422 = vadd.xlane.f32.xlu1 %v421_v8 }
 0x464   :  { %1500 = vpow2.f32 %v653_v7 }
 0x467   :  { %v770_v9 = vpop.xlane.xlu0 %769 }
 0x468   :  { %v771_v12 = vsub.f32 %v767_v33, %v770_v9 }
 0x469   :  { %v1747_v13 = vpop.eup %1498 }
 0x46a   :  { %v772_v14 = vmul.f32 1.442695, %v771_v12  ;;  %v538_v15 = vsel %vm252_vm2, %v1747_v13, 0.0 }
 0x46b   :  { %539 = vadd.xlane.f32.xlu0 %v538_v15 }
 0x46c   :  { %1502 = vpow2.f32 %v772_v14 }
 0x46f   :  { %v884_v25 = vpop.xlane.xlu1 %883 }
 0x470   :  { %v885_v26 = vsub.f32 %v1724_v39, %v884_v25 }
 0x471   :  { %v1751_v16 = vpop.eup %1500 }
 0x472   :  { %v655_v17 = vsel %vm252_vm2, %v1751_v16, 0.0  ;;  %v886_v29 = vmul.f32 1.442695, %v885_v26 }
 0x473   :  { %656 = vadd.xlane.f32.xlu1 %v655_v17  ;;  %v428_v32 = vpop.permute.xlu1 %427 }
 0x477   :  { %v1000_v18 = vpop.xlane.xlu0 %999 }
 0x478   :  { %v1001_v19 = vsub.f32 %v997_v45, %v1000_v18  ;;  %v433_v45 = vsel %vm318_vm3, %v428_v32, 0 }
 0x479   :  { %v1755_v20 = vpop.eup %1502 }
 0x47a   :  { %v1002_v21 = vmul.f32 1.442695, %v1001_v19  ;;  %v774_v22 = vsel %vm252_vm2, %v1755_v20, 0.0 }
 0x47b   :  { %775 = vadd.xlane.f32.xlu1 %v774_v22  ;;  %v314_v23 = vpop.permute.xlu0 %313 }
 0x47c   :  { %1504 = vpow2.f32 %v1002_v21  ;;  %v320_v24 = vsel %vm318_vm3, %v314_v23, 0 }
 0x47d   :  { %1371 = vmatpush3.bf16.msra.mxu0 %v320_v24  ;;  %1506 = vpow2.f32 %v886_v29 }
 0x47e   :  { %1382 = vmatprep.subr.bf16.mxu0 %v1548_v1 }
 0x481   :  { %661 = vrot.lane.b32.xlu0 %v248_v52, %s1561_s30 }
 0x489   :  { %v1762_v27 = vpop.eup %1504 }
 0x48a   :  { %v1004_v28 = vsel %vm252_vm2, %v1762_v27, 0.0  ;;  %v1766_v30 = vpop.eup %1506 }
 0x48b   :  { %1005 = vadd.xlane.f32.xlu1 %v1004_v28  ;;  %v888_v31 = vsel %vm252_vm2, %v1766_v30, 0.0 }
 0x4a0   :  { %889 = vadd.xlane.f32.xlu0 %v888_v31 }
 0x4a4   :  { %v1116_v33 = vpop.xlane.xlu1 %1115 }
 0x4a5   :  { %v1117_v34 = vsub.f32 %v1733_v55, %v1116_v33 }
 0x4a7   :  { %v1118_v35 = vmul.f32 1.442695, %v1117_v34 }
 0x4a8   :  { %v545_v40 = vpop.permute.xlu1 %544 }
 0x4a9   :  { %1508 = vpow2.f32 %v1118_v35  ;;  %v550_v50 = vsel %vm318_vm3, %v545_v40, 0 }
 0x4b6   :  { %v1773_v37 = vpop.eup %1508  ;;  %894 = vrot.lane.b32.xlu0 %v717_v36, %s1558_s27 }
 0x4b7   :  { %v1120_v38 = vsel %vm252_vm2, %v1773_v37, 0.0 }
 0x4b8   :  { %1121 = vadd.xlane.f32.xlu1 %v1120_v38 }
 0x4ba   :  { %1010 = vrot.lane.b32.xlu0 %v717_v36, %s1560_s29 }
 0x4be   :  { %1126 = vrot.lane.b32.xlu0 %v717_v36, %s1561_s30 }
 0x4c9   :  { %781 = vrot.lane.b32.xlu1 %v717_v36, %s1559_s28 }
 0x4e4   :  { %v308_v39 = vpop.xlane.xlu0 %307 }
 0x4e5   :  { %1510 = vrcp.f32 %v308_v39 }
 0x4ec   :  { %v423_v41 = vpop.xlane.xlu1 %422 }
 0x4ed   :  { %1512 = vrcp.f32 %v423_v41 }
 0x4f2   :  { %v1511_v42 = vpop.eup %1510 }
 0x4f3   :  { %v310_v11 = vmul.f32 %v1511_v42, %v1739_v0 }
 0x4f4   :  { %v540_v43 = vpop.xlane.xlu0 %539 }
 0x4f5   :  { %1514 = vrcp.f32 %v540_v43  ;;  %v311_v44 = vpack.c.bf16 %v310_v11, %v310_v11  ;;  %v1492_v43 = vld [vmem:[%s1847_s3 + $0x8] sm:$0xff]  }
 0x4f6   :  { %1461 = vmatpush3.bf16.msra.mxu1 %v1492_v43 }
 0x4f7   :  { %1373 = vmatmul.mubr.msk.bf16.vlgmr.msra.gmra.mxu0 %vm252_vm2, %v311_v44  ;;  %1462 = vmatprep.subr.bf16.mxu1 %v1548_v1 }
 0x4f8   :  { %1383 = vmatpush3.bf16.msra.mxu0 %v433_v45  ;;  %1384 = vmatprep.mubr.msk.bf16.mxu0 %vm1549_vm0, %v1548_v1  ;;  %v662_v53 = vpop.permute.xlu0 %661  ;;  %v1493_v45 = vld [vmem:[%s1847_s3] sm:$0xff]  }
 0x4f9   :  { %1394 = vmatprep.subr.bf16.mxu0 %v1548_v1  ;;  %v667_v55 = vsel %vm318_vm3, %v662_v53, 0 }
 0x4fa   :  { %v1513_v46 = vpop.eup %1512  ;;  %1463 = vmatpush3.bf16.msra.mxu1 %v1493_v45 }
 0x4fb   :  { %v425_v47 = vmul.f32 %v1513_v46, %v1743_v6 }
 0x4fc   :  { %v657_v48 = vpop.xlane.xlu1 %656 }
 0x4fd   :  { %1516 = vrcp.f32 %v657_v48  ;;  %v426_v49 = vpack.c.bf16 %v425_v47, %v425_v47 }
 0x4ff   :  { %1385 = vmatmul.mubr.msk.bf16.vlgmr.msra.gmra.mxu0 %vm252_vm2, %v426_v49 }
 0x500   :  { %1395 = vmatpush3.bf16.msra.mxu0 %v550_v50  ;;  %1396 = vmatprep.mubr.msk.bf16.mxu0 %vm1549_vm0, %v1548_v1 }
 0x501   :  { %1406 = vmatprep.subr.bf16.mxu0 %v1548_v1 }
 0x502   :  { %v1515_v51 = vpop.eup %1514 }
 0x503   :  { %v542_v52 = vmul.f32 %v1515_v51, %v1747_v13 }
 0x504   :  { %v776_v58 = vpop.xlane.xlu1 %775 }
 0x505   :  { %v543_v54 = vpack.c.bf16 %v542_v52, %v542_v52  ;;  %1518 = vrcp.f32 %v776_v58 }
 0x507   :  { %1397 = vmatmul.mubr.msk.bf16.vlgmr.msra.gmra.mxu0 %vm252_vm2, %v543_v54 }
 0x508   :  { %1407 = vmatpush3.bf16.msra.mxu0 %v667_v55  ;;  %1408 = vmatprep.mubr.msk.bf16.mxu0 %vm1549_vm0, %v1548_v1 }
 0x509   :  { %1418 = vmatprep.subr.bf16.mxu0 %v1548_v1 }
 0x50a   :  { %v1517_v56 = vpop.eup %1516 }
 0x50b   :  { %v659_v57 = vmul.f32 %v1517_v56, %v1751_v16 }
 0x50d   :  { %v660_v10 = vpack.c.bf16 %v659_v57, %v659_v57 }
 0x50f   :  { %1409 = vmatmul.mubr.msk.bf16.vlgmr.msra.gmra.mxu0 %vm252_vm2, %v660_v10 }
 0x510   :  { %1420 = vmatprep.mubr.msk.bf16.mxu0 %vm1549_vm0, %v1548_v1 }
 0x512   :  { %v1519_v61 = vpop.eup %1518 }
 0x513   :  { %v778_v63 = vmul.f32 %v1519_v61, %v1755_v20  ;;  %v1292_v61 = vld [vmem:[%s1848_s4] ss:$0 sm:$0xff] }
 0x514   :  { %v1006_v60 = vpop.xlane.xlu1 %1005 }
 0x515   :  { %v779_v4 = vpack.c.bf16 %v778_v63, %v778_v63 }
 0x529   :  { %v890_v59 = vpop.xlane.xlu0 %889 }
 0x52a   :  { %1520 = vrcp.f32 %v890_v59 }
 0x52b   :  { %1522 = vrcp.f32 %v1006_v60 }
 0x52d   :  { %v895_v3 = vpop.permute.xlu0 %894 }
 0x52e   :  { %v900_v6 = vsel %vm318_vm3, %v895_v3, 0 }
 0x531   :  { %v1011_v8 = vpop.permute.xlu0 %1010 }
 0x532   :  { %v1016_v13 = vsel %vm318_vm3, %v1011_v8, 0 }
 0x535   :  { %v1127_v15 = vpop.permute.xlu0 %1126 }
 0x536   :  { %v1132_v18 = vsel %vm318_vm3, %v1127_v15, 0 }
 0x537   :  { %v1521_v5 = vpop.eup %1520 }
 0x538   :  { %v892_v7 = vmul.f32 %v1521_v5, %v1766_v30  ;;  %v1523_v12 = vpop.eup %1522 }
 0x539   :  { %v1008_v14 = vmul.f32 %v1523_v12, %v1762_v27 }
 0x53a   :  { %v893_v9 = vpack.c.bf16 %v892_v7, %v892_v7 }
 0x53b   :  { %v1009_v16 = vpack.c.bf16 %v1008_v14, %v1008_v14 }
 0x541   :  { %v1122_v62 = vpop.xlane.xlu1 %1121 }
 0x542   :  { %1524 = vrcp.f32 %v1122_v62 }
 0x545   :  { %v782_v0 = vpop.permute.xlu1 %781 }
 0x546   :  { %v787_v2 = vsel %vm318_vm3, %v782_v0, 0 }
 0x547   :  { %1419 = vmatpush3.bf16.msra.mxu0 %v787_v2 }
 0x548   :  { %1430 = vmatprep.subr.bf16.mxu0 %v1548_v1 }
 0x54a   :  { %1421 = vmatmul.mubr.msk.bf16.vlgmr.msra.gmra.mxu0 %vm252_vm2, %v779_v4 }
 0x54b   :  { %1431 = vmatpush3.bf16.msra.mxu0 %v900_v6  ;;  %1432 = vmatprep.mubr.msk.bf16.mxu0 %vm1549_vm0, %v1548_v1 }
 0x54c   :  { %1442 = vmatprep.subr.bf16.mxu0 %v1548_v1 }
 0x54f   :  { %v1525_v17 = vpop.eup %1524 }
 0x550   :  { %v1124_v19 = vmul.f32 %v1525_v17, %v1773_v37 }
 0x552   :  { %1433 = vmatmul.mubr.msk.bf16.vlgmr.msra.gmra.mxu0 %vm252_vm2, %v893_v9  ;;  %v1125_v20 = vpack.c.bf16 %v1124_v19, %v1124_v19 }
 0x553   :  { %1443 = vmatpush3.bf16.msra.mxu0 %v1016_v13  ;;  %1444 = vmatprep.mubr.msk.bf16.mxu0 %vm1549_vm0, %v1548_v1 }
 0x554   :  { %1454 = vmatprep.subr.bf16.mxu0 %v1548_v1 }
 0x55a   :  { %1445 = vmatmul.mubr.msk.bf16.vlgmr.msra.gmra.mxu0 %vm252_vm2, %v1009_v16 }
 0x55b   :  { %1455 = vmatpush3.bf16.msra.mxu0 %v1132_v18  ;;  %1456 = vmatprep.mubr.msk.bf16.mxu0 %vm1549_vm0, %v1548_v1 }
 0x562   :  { %1457 = vmatmul.mubr.msk.bf16.vlgmr.msra.gmra.mxu0 %vm252_vm2, %v1125_v20 }
 0x5b7   :  { %v356_v21 = vpop.f32.mrf.mxu0 }
 0x5b8   :  { %362 = vst.msk [vmem:[#allocation2] sm:$0xff] %vm252_vm2, %v356_v21 }
 0x5b9   :  { %v1374_v22 = vpop.f32.mrf.mxu0 }
 0x5bb   :  { %v359_v23 = vpop.f32.mrf.mxu0 }
 0x5bd   :  { %v1375_v24 = vpop.f32.mrf.mxu0 }
 0x5bf   :  { %v469_v25 = vpop.f32.mrf.mxu0 }
 0x5c0   :  { %476 = vrot.lane.b32.xlu1 %v469_v25, %s1562_s9 }
 0x5c1   :  { %v1386_v26 = vpop.f32.mrf.mxu0 }
 0x5c3   :  { %v472_v27 = vpop.f32.mrf.mxu0 }
 0x5c5   :  { %v1387_v28 = vpop.f32.mrf.mxu0 }
 0x5c7   :  { %v586_v29 = vpop.f32.mrf.mxu0 }
 0x5c8   :  { %593 = vrot.lane.b32.xlu1 %v586_v29, %s1563_s10 }
 0x5c9   :  { %v1398_v30 = vpop.f32.mrf.mxu0 }
 0x5cb   :  { %v589_v31 = vpop.f32.mrf.mxu0 }
 0x5cd   :  { %v1399_v32 = vpop.f32.mrf.mxu0 }
 0x5cf   :  { %v703_v33 = vpop.f32.mrf.mxu0 }
 0x5d0   :  { %710 = vrot.lane.b32.xlu1 %v703_v33, %s1564_s1 }
 0x5d1   :  { %v1410_v34 = vpop.f32.mrf.mxu0 }
 0x5d3   :  { %v706_v35 = vpop.f32.mrf.mxu0 }
 0x5d5   :  { %v1411_v36 = vpop.f32.mrf.mxu0 }
 0x60a   :  { %v823_v37 = vpop.f32.mrf.mxu0 }
 0x60b   :  { %829 = vst.msk [vmem:[#allocation2 + $0x8] sm:$0xff] %vm252_vm2, %v823_v37 }
 0x60c   :  { %v1422_v38 = vpop.f32.mrf.mxu0 }
 0x60e   :  { %v826_v39 = vpop.f32.mrf.mxu0 }
 0x610   :  { %v1423_v40 = vpop.f32.mrf.mxu0 }
 0x612   :  { %v936_v41 = vpop.f32.mrf.mxu0 }
 0x613   :  { %943 = vrot.lane.b32.xlu0 %v936_v41, %s1562_s9 }
 0x614   :  { %v1434_v42 = vpop.f32.mrf.mxu0 }
 0x616   :  { %v939_v11 = vpop.f32.mrf.mxu0 }
 0x618   :  { %v1435_v44 = vpop.f32.mrf.mxu0 }
 0x61a   :  { %v1052_v46 = vpop.f32.mrf.mxu0 }
 0x61b   :  { %1059 = vrot.lane.b32.xlu0 %v1052_v46, %s1563_s10 }
 0x61c   :  { %v1446_v47 = vpop.f32.mrf.mxu0 }
 0x61e   :  { %v1055_v48 = vpop.f32.mrf.mxu0 }
 0x620   :  { %v1447_v49 = vpop.f32.mrf.mxu0 }
 0x622   :  { %v1168_v50 = vpop.f32.mrf.mxu0 }
 0x623   :  { %1175 = vrot.lane.b32.xlu0 %v1168_v50, %s1564_s1 }
 0x624   :  { %v1458_v51 = vpop.f32.mrf.mxu0 }
 0x626   :  { %v1171_v52 = vpop.f32.mrf.mxu0 }
 0x628   :  { %v1459_v53 = vpop.f32.mrf.mxu0 }
 0x632   :  { %v477_v54 = vpop.permute.xlu1 %476 }
 0x633   :  { %480 = vst.msk [vmem:[#allocation2] sm:$0xff] %vm479_vm4, %v477_v54 }
 0x63a   :  { %v594_v55 = vpop.permute.xlu1 %593 }
 0x63b   :  { %597 = vst.msk [vmem:[#allocation2] sm:$0xff] %vm596_vm5, %v594_v55 }
 0x642   :  { %v711_v56 = vpop.permute.xlu1 %710 }
 0x643   :  { %714 = vst.msk [vmem:[#allocation2] sm:$0xff] %vm713_vm6, %v711_v56 }
 0x64a   :  { %v1179_v58 = vld [vmem:[#allocation2] sm:$0xff] }
 0x685   :  { %v944_v1 = vpop.permute.xlu0 %943 }
 0x686   :  { %946 = vst.msk [vmem:[#allocation2 + $0x8] sm:$0xff] %vm479_vm4, %v944_v1 }
 0x68d   :  { %v1060_v57 = vpop.permute.xlu0 %1059 }
 0x68e   :  { %1062 = vst.msk [vmem:[#allocation2 + $0x8] sm:$0xff] %vm596_vm5, %v1060_v57 }
 0x695   :  { %v1176_v10 = vpop.permute.xlu0 %1175 }
 0x696   :  { %1178 = vst.msk [vmem:[#allocation2 + $0x8] sm:$0xff] %vm713_vm6, %v1176_v10 }
 0x69d   :  { %v1180_v59 = vld [vmem:[#allocation2 + $0x8] sm:$0xff] }
 0x69e   :  { %v1181_v60 = vpack.c.bf16 %v1180_v59, %v1179_v58 }
 0x6a0   :  { %1465 = vmatmul.mubr.msk.bf16.vlgmr.msra.gmra.mxu1 %vm61_vm1, %v1181_v60 }
 0x760   :  { %v1242_v62 = vpop.f32.mrf.mxu1 }
 0x761   :  { %v1243_v63 = vadd.f32 %v1292_v61, %v1242_v62 }
 0x762   :  { %v1466_v0 = vpop.f32.mrf.mxu1 }
 0x763   :  { %1249 = vst.msk [vmem:[#allocation3] sm:$0xff] %vm61_vm1, %v1243_v63 }
 0x764   :  { %v1245_v2 = vpop.f32.mrf.mxu1 }
 0x765   :  { %v1246_v3 = vadd.f32 %v1292_v61, %v1245_v2 }
 0x766   :  { %v1467_v4 = vpop.f32.mrf.mxu1 }
 0x767   :  { %1250 = vst.msk [vmem:[#allocation3 + $0x8] sm:$0xff] %vm61_vm1, %v1246_v3 }
 0x768   :  { %1537 = shalt.err (!%p1534_p4)
}
 0x769   :  { %s1566_s4 = smov 128  }
 0x76a   :  { %1262 = dma.vmem_to_hbm [thread:$0]  %s1257_s15, 256, %s1852_s8, [#allocation4], %s1566_s4, %s1566_s4, %s1562_s9  }
 0x76b   :  { %1546 = dma.done.wait [#allocation4], 256  }
 0x76c   :  { %1547 = vsyncadd [#allocation4], 4294967040 }
 0x76d   :  { %1266 = vsyncpa [#allocation4], 1 }

</bundles_post_ra>
